<compile_context>
chip_gen: v7x
topology: tpu7x:2x2x1
jax: 0.10.0
libtpu: 0.0.40
codegen_flags: <defaults>
</compile_context>

<pallas_src>
import math
import numpy as np
import jax
import jax.numpy as jnp
from jax.experimental import pallas as pl
from jax.experimental.pallas import tpu as pltpu

STATE_DIM = 2
HIDDEN_DIM = 16
OUT_DIM = 2

LANES = 128     # lane padding for all feature dims
TILE_B = 128    # batch rows per grid step


def sgd_policy_kernel(x_ref, w1_ref, w23_ref, b_ref, mean_ref):
    """x_ref:    (TILE_B, 2)     state tile
       w1_ref:   (2, 128)        layer-1 weight, out-dim zero-padded to 128 lanes
       w23_ref:  (2, 128, 128)   layers 2/3 weights, zero-padded (in x out)
       b_ref:    (3, 128)        biases, zero-padded
       mean_ref: (TILE_B, 128)   lane 0 = radius_mean, lane 1 = angle_mean"""
    x = x_ref[...]                                              # (TILE_B, 2)

    # Layer 1 (K=2): two VPU FMAs with lane-broadcast state columns; avoids an
    # MXU push/drain latency chain for a 2-deep contraction.
    h = (x[:, 0:1] * w1_ref[0:1, :]
         + x[:, 1:2] * w1_ref[1:2, :]
         + b_ref[0:1, :])                                       # (TILE_B, 128)
    h = jnp.maximum(h, 0.0)

    # Layer 2 (MXU): full 128-lane activation into zero-padded weights, so no
    # 16-lane slice/relayout sits in front of the matmul.
    h = jnp.dot(h, w23_ref[0], preferred_element_type=jnp.float32) + b_ref[1:2, :]
    h = jnp.maximum(h, 0.0)

    # Layer 3 (MXU): only lanes 0..1 of the result are meaningful.
    out = jnp.dot(h, w23_ref[1], preferred_element_type=jnp.float32) + b_ref[2:3, :]

    # sigmoid(out) * [5.0, 2*pi, 2*pi, ...] + 1e-6 ; padded lanes / padded batch
    # rows hold harmless garbage that the wrapper slices off.
    lane = jax.lax.broadcasted_iota(jnp.int32, (1, LANES), 1)
    scale = jnp.where(lane == 0, 5.0, 2.0 * math.pi)
    mean_ref[...] = jax.nn.sigmoid(out) * scale + 1e-6


@jax.jit
def _policy_means(states, w1, w23, b):
    """states: (B, 2) float32 -> (B, 2) array of [radius_mean, angle_mean]."""
    B = states.shape[0]
    Bp = -(-B // TILE_B) * TILE_B
    if Bp != B:
        states = jnp.pad(states, ((0, Bp - B), (0, 0)))
    grid = (Bp // TILE_B,)
    cost = pl.CostEstimate(
        flops=Bp * (4 * LANES + 2 * 2 * LANES * LANES),
        transcendentals=Bp * LANES,
        bytes_accessed=(Bp * STATE_DIM + STATE_DIM * LANES
                        + 2 * LANES * LANES + 3 * LANES + Bp * LANES) * 4,
    )
    means = pl.pallas_call(
        sgd_policy_kernel,
        out_shape=jax.ShapeDtypeStruct((Bp, LANES), jnp.float32),
        grid=grid,
        in_specs=[
            pl.BlockSpec((TILE_B, STATE_DIM), lambda i: (i, 0)),
            pl.BlockSpec((STATE_DIM, LANES), lambda i: (0, 0)),     # VMEM-resident
            pl.BlockSpec((2, LANES, LANES), lambda i: (0, 0, 0)),   # VMEM-resident
            pl.BlockSpec((3, LANES), lambda i: (0, 0)),             # VMEM-resident
        ],
        out_specs=pl.BlockSpec((TILE_B, LANES), lambda i: (i, 0)),
        compiler_params=pltpu.CompilerParams(
            dimension_semantics=("parallel",)),
        cost_estimate=cost,
    )(states, w1, w23, b)
    return means[:B, :OUT_DIM]


def prepare_params(params):
    """One-time pack/pad of parameters into kernel-ready cached arrays.
    NOTE: weights here are (in_features, out_features); a real torch state_dict
    (out_features, in_features) would need a transpose before this call."""
    w1, b1, w2, b2, w3, b3, radius_std_p, angle_std_p = params
    w1_pad = jnp.zeros((STATE_DIM, LANES), jnp.float32)
    w1_pad = w1_pad.at[:, :HIDDEN_DIM].set(jnp.asarray(w1, jnp.float32))
    w23 = jnp.zeros((2, LANES, LANES), jnp.float32)
    w23 = w23.at[0, :HIDDEN_DIM, :HIDDEN_DIM].set(jnp.asarray(w2, jnp.float32))
    w23 = w23.at[1, :HIDDEN_DIM, :OUT_DIM].set(jnp.asarray(w3, jnp.float32))
    b = jnp.zeros((3, LANES), jnp.float32)
    b = b.at[0, :HIDDEN_DIM].set(jnp.asarray(b1, jnp.float32))
    b = b.at[1, :HIDDEN_DIM].set(jnp.asarray(b2, jnp.float32))
    b = b.at[2, :OUT_DIM].set(jnp.asarray(b3, jnp.float32))
    # State-independent stds: computed once here, not in the kernel.
    radius_std = jnp.clip(jnp.exp(jnp.asarray(radius_std_p, jnp.float32)), 1e-6, 2.0)
    angle_std = jnp.clip(jnp.exp(jnp.asarray(angle_std_p, jnp.float32)), 1e-6, 2.0)
    return w1_pad, w23, b, radius_std, angle_std


def sgd_policy_forward_batch(states, prepped):
    """states: (B, 2) -> (radius_means (B,), angle_means (B,), radius_std, angle_std)."""
    w1, w23, b, radius_std, angle_std = prepped
    means = _policy_means(jnp.asarray(states, jnp.float32), w1, w23, b)
    return means[:, 0], means[:, 1], radius_std, angle_std


def sgd_policy_forward(state, prepped):
    """Single state (2,) -> (radius_mean, radius_std, angle_mean, angle_std)."""
    rm, am, radius_std, angle_std = sgd_policy_forward_batch(
        jnp.asarray(state, jnp.float32)[None, :], prepped)
    return rm[0], radius_std, am[0], angle_std


def _normal_log_prob(x, mean, std):
    return (-0.5 * jnp.square((x - mean) / std)
            - jnp.log(std) - 0.5 * math.log(2.0 * math.pi))


@jax.jit
def select_actions(key, states, w1, w23, b, radius_std, angle_std):
    """Fused on-device step: policy kernel -> Normal sampling -> log_prob.
    Avoids a host round-trip per action (the real wall-clock cost at this size)."""
    means = _policy_means(states, w1, w23, b)
    radius_mean, angle_mean = means[:, 0], means[:, 1]
    kr, ka = jax.random.split(key)
    radius = radius_mean + radius_std * jax.random.normal(kr, radius_mean.shape)
    angle = angle_mean + angle_std * jax.random.normal(ka, angle_mean.shape)
    return (radius, angle,
            _normal_log_prob(radius, radius_mean, radius_std),
            _normal_log_prob(angle, angle_mean, angle_std))


def init_params(key, state_dim=STATE_DIM, hidden_dim=HIDDEN_DIM, out_dim=OUT_DIM):
    """Deterministic init mimicking PyTorch Linear default (uniform +-1/sqrt(fan_in)).
    Weights are stored (in_features, out_features)."""
    ks = jax.random.split(key, 6)

    def lin(kw, kb, fan_in, fan_out):
        bound = 1.0 / math.sqrt(fan_in)
        w = jax.random.uniform(kw, (fan_in, fan_out), jnp.float32, -bound, bound)
        b = jax.random.uniform(kb, (fan_out,), jnp.float32, -bound, bound)
        return w, b

    w1, b1 = lin(ks[0], ks[1], state_dim, hidden_dim)
    w2, b2 = lin(ks[2], ks[3], hidden_dim, hidden_dim)
    w3, b3 = lin(ks[4], ks[5], hidden_dim, out_dim)
    radius_std_p = jnp.float32(1.0)   # nn.Parameter(torch.tensor(1.0))
    angle_std_p = jnp.float32(1.0)
    return (w1, b1, w2, b2, w3, b3, radius_std_p, angle_std_p)


def ref_means_batch(states, params):
    """Pure-JAX reference for the state-dependent means."""
    w1, b1, w2, b2, w3, b3, _, _ = params
    x = jnp.asarray(states, jnp.float32)
    h = jnp.maximum(x @ w1 + b1, 0.0)
    h = jnp.maximum(h @ w2 + b2, 0.0)
    out = h @ w3 + b3
    radius_mean = jax.nn.sigmoid(out[:, 0]) * 5.0 + 1e-6
    angle_mean = jax.nn.sigmoid(out[:, 1]) * 2.0 * math.pi + 1e-6
    return radius_mean, angle_mean


def ref_forward(state, params):
    """Pure-JAX reference matching the PyTorch forward semantics (single state)."""
    rm, am = ref_means_batch(jnp.asarray(state, jnp.float32)[None, :], params)
    radius_std = jnp.clip(jnp.exp(params[6]), 1e-6, 2.0)
    angle_std = jnp.clip(jnp.exp(params[7]), 1e-6, 2.0)
    return rm[0], radius_std, am[0], angle_std


if __name__ == "__main__":
    key = jax.random.PRNGKey(0)
    k_params, k_state, k_act = jax.random.split(key, 3)
    params = init_params(k_params)
    prepped = prepare_params(params)          # one-time pack/pad (cached)
    w1p, w23p, bp, radius_std, angle_std = prepped

    # Batched states: B=200 exercises padding + a 2-step grid.
    B = 200
    states = jax.random.normal(k_state, (B, STATE_DIM), jnp.float32)

    rm, am, rs, a_s = sgd_policy_forward_batch(states, prepped)
    rm, am = jax.block_until_ready((rm, am))

    ref_rm, ref_am = ref_means_batch(states, params)
    np.testing.assert_allclose(np.asarray(rm), np.asarray(ref_rm), rtol=1e-4, atol=1e-4)
    np.testing.assert_allclose(np.asarray(am), np.asarray(ref_am), rtol=1e-4, atol=1e-4)

    # Single-state path (matches PyTorch forward(state) distribution params).
    out1 = jax.block_until_ready(sgd_policy_forward(states[0], prepped))
    ref1 = ref_forward(states[0], params)
    for got, want in zip(out1, ref1):
        np.testing.assert_allclose(np.asarray(got), np.asarray(want), rtol=1e-4, atol=1e-4)

    # Fused on-device kernel + sampling + log_prob (no host round-trip).
    acts = jax.block_until_ready(select_actions(k_act, states, w1p, w23p, bp,
                                                radius_std, angle_std))

    # TODO(synk): the Adam update() / returns-normalization step stays in host
    # JAX/optax; the kernel only implements the forward distribution parameters.
    print("KERNEL_OK")
</pallas_src>

<mosaic_0001>
module attributes {stable_mosaic.version = 11 : i64} {
  func.func @sgd_policy_kernel(%arg0: i32, %arg1: memref<128x2xf32, #tpu.memory_space<vmem>>, %arg2: memref<2x128xf32, #tpu.memory_space<vmem>>, %arg3: memref<2x128x128xf32, #tpu.memory_space<vmem>>, %arg4: memref<3x128xf32, #tpu.memory_space<vmem>>, %arg5: memref<128x128xf32, #tpu.memory_space<vmem>>) attributes {dimension_semantics = [#tpu.dimension_semantics<parallel>], iteration_bounds = array<i64: 2>, scalar_prefetch = 0 : i64, scratch_operands = 0 : i64, tpu.core_type = #tpu.core_type<tc>, window_params = [{transform_indices = @transform_0, window_bounds = array<i64: 128, 2>}, {pipeline_mode = #tpu.pipeline_mode<synchronous>, transform_indices = @transform_1, window_bounds = array<i64: 2, 128>}, {pipeline_mode = #tpu.pipeline_mode<synchronous>, transform_indices = @transform_2, window_bounds = array<i64: 2, 128, 128>}, {pipeline_mode = #tpu.pipeline_mode<synchronous>, transform_indices = @transform_3, window_bounds = array<i64: 3, 128>}, {transform_indices = @transform_4, window_bounds = array<i64: 128, 128>}]} {
    %c0 = arith.constant 0 : index
    %c0_0 = arith.constant 0 : index
    %0 = vector.load %arg1[%c0, %c0_0] : memref<128x2xf32, #tpu.memory_space<vmem>>, vector<128x2xf32>
    %1 = vector.extract_strided_slice %0 {offsets = [0, 0], sizes = [128, 1], strides = [1, 1]} : vector<128x2xf32> to vector<128x1xf32>
    %c0_1 = arith.constant 0 : index
    %c0_2 = arith.constant 0 : index
    %2 = vector.load %arg2[%c0_1, %c0_2] : memref<2x128xf32, #tpu.memory_space<vmem>>, vector<1x128xf32>
    %3 = vector.broadcast %1 : vector<128x1xf32> to vector<128x128xf32>
    %4 = vector.broadcast %2 : vector<1x128xf32> to vector<128x128xf32>
    %5 = arith.mulf %3, %4 : vector<128x128xf32>
    %6 = vector.extract_strided_slice %0 {offsets = [0, 1], sizes = [128, 1], strides = [1, 1]} : vector<128x2xf32> to vector<128x1xf32>
    %c1 = arith.constant 1 : index
    %c0_3 = arith.constant 0 : index
    %7 = vector.load %arg2[%c1, %c0_3] : memref<2x128xf32, #tpu.memory_space<vmem>>, vector<1x128xf32>
    %8 = vector.broadcast %6 : vector<128x1xf32> to vector<128x128xf32>
    %9 = vector.broadcast %7 : vector<1x128xf32> to vector<128x128xf32>
    %10 = arith.mulf %8, %9 : vector<128x128xf32>
    %11 = arith.addf %5, %10 : vector<128x128xf32>
    %c0_4 = arith.constant 0 : index
    %c0_5 = arith.constant 0 : index
    %12 = vector.load %arg4[%c0_4, %c0_5] : memref<3x128xf32, #tpu.memory_space<vmem>>, vector<1x128xf32>
    %13 = vector.broadcast %12 : vector<1x128xf32> to vector<128x128xf32>
    %14 = arith.addf %11, %13 : vector<128x128xf32>
    %cst = arith.constant 0.000000e+00 : f32
    %15 = vector.broadcast %cst : f32 to vector<128x128xf32>
    %16 = arith.maximumf %14, %15 : vector<128x128xf32>
    %c0_6 = arith.constant 0 : index
    %c0_7 = arith.constant 0 : index
    %c0_8 = arith.constant 0 : index
    %17 = vector.load %arg3[%c0_6, %c0_7, %c0_8] : memref<2x128x128xf32, #tpu.memory_space<vmem>>, vector<1x128x128xf32>
    %18 = vector.shape_cast %17 : vector<1x128x128xf32> to vector<128x128xf32>
    %cst_9 = arith.constant dense<0.000000e+00> : vector<128x128xf32>
    %19 = tpu.matmul %16, %18, %cst_9 {dimension_numbers = #tpu.dot_dimension_numbers<[1], [0], [0], [1], [0, 0, 1, 1], [], []>} : vector<128x128xf32>, vector<128x128xf32>, vector<128x128xf32> -> vector<128x128xf32>
    %c1_10 = arith.constant 1 : index
    %c0_11 = arith.constant 0 : index
    %20 = vector.load %arg4[%c1_10, %c0_11] : memref<3x128xf32, #tpu.memory_space<vmem>>, vector<1x128xf32>
    %21 = vector.broadcast %20 : vector<1x128xf32> to vector<128x128xf32>
    %22 = arith.addf %19, %21 : vector<128x128xf32>
    %cst_12 = arith.constant 0.000000e+00 : f32
    %23 = vector.broadcast %cst_12 : f32 to vector<128x128xf32>
    %24 = arith.maximumf %22, %23 : vector<128x128xf32>
    %c1_13 = arith.constant 1 : index
    %c0_14 = arith.constant 0 : index
    %c0_15 = arith.constant 0 : index
    %25 = vector.load %arg3[%c1_13, %c0_14, %c0_15] : memref<2x128x128xf32, #tpu.memory_space<vmem>>, vector<1x128x128xf32>
    %26 = vector.shape_cast %25 : vector<1x128x128xf32> to vector<128x128xf32>
    %cst_16 = arith.constant dense<0.000000e+00> : vector<128x128xf32>
    %27 = tpu.matmul %24, %26, %cst_16 {dimension_numbers = #tpu.dot_dimension_numbers<[1], [0], [0], [1], [0, 0, 1, 1], [], []>} : vector<128x128xf32>, vector<128x128xf32>, vector<128x128xf32> -> vector<128x128xf32>
    %c2 = arith.constant 2 : index
    %c0_17 = arith.constant 0 : index
    %28 = vector.load %arg4[%c2, %c0_17] : memref<3x128xf32, #tpu.memory_space<vmem>>, vector<1x128xf32>
    %29 = vector.broadcast %28 : vector<1x128xf32> to vector<128x128xf32>
    %30 = arith.addf %27, %29 : vector<128x128xf32>
    %31 = tpu.iota {dimensions = array<i32: 1>} : vector<1x128xi32>
    %c0_i32 = arith.constant 0 : i32
    %32 = vector.broadcast %c0_i32 : i32 to vector<1x128xi32>
    %33 = arith.cmpi eq, %31, %32 : vector<1x128xi32>
    %cst_18 = arith.constant 5.000000e+00 : f32
    %cst_19 = arith.constant 6.28318548 : f32
    %34 = vector.broadcast %cst_18 : f32 to vector<1x128xf32>
    %35 = vector.broadcast %cst_19 : f32 to vector<1x128xf32>
    %36 = arith.select %33, %34, %35 : vector<1x128xi1>, vector<1x128xf32>
    %37 = arith.negf %30 : vector<128x128xf32>
    %38 = math.exp %37 : vector<128x128xf32>
    %cst_20 = arith.constant 1.000000e+00 : f32
    %39 = vector.broadcast %cst_20 : f32 to vector<128x128xf32>
    %40 = arith.addf %39, %38 : vector<128x128xf32>
    %41 = arith.divf %39, %40 : vector<128x128xf32>
    %42 = vector.broadcast %36 : vector<1x128xf32> to vector<128x128xf32>
    %43 = arith.mulf %41, %42 : vector<128x128xf32>
    %cst_21 = arith.constant 9.99999997E-7 : f32
    %44 = vector.broadcast %cst_21 : f32 to vector<128x128xf32>
    %45 = arith.addf %43, %44 : vector<128x128xf32>
    %c0_22 = arith.constant 0 : index
    %c0_23 = arith.constant 0 : index
    %46 = vector.load %arg5[%c0_22, %c0_23] : memref<128x128xf32, #tpu.memory_space<vmem>>, vector<128x128xf32>
    tpu.vector_store %arg5[%c0_22, %c0_23], %45 {strides = array<i32>} : memref<128x128xf32, #tpu.memory_space<vmem>>, vector<128x128xf32>,
    return
  }
  func.func @transform_0(%arg0: i32) -> (i32, i32) {
    %c0_i32 = arith.constant 0 : i32
    %c0_i32_0 = arith.constant 0 : i32
    return %arg0, %c0_i32 : i32, i32
  }
  func.func @transform_1(%arg0: i32) -> (i32, i32) {
    %c0_i32 = arith.constant 0 : i32
    %c0_i32_0 = arith.constant 0 : i32
    %c0_i32_1 = arith.constant 0 : i32
    return %c0_i32, %c0_i32_0 : i32, i32
  }
  func.func @transform_2(%arg0: i32) -> (i32, i32, i32) {
    %c0_i32 = arith.constant 0 : i32
    %c0_i32_0 = arith.constant 0 : i32
    %c0_i32_1 = arith.constant 0 : i32
    %c0_i32_2 = arith.constant 0 : i32
    return %c0_i32, %c0_i32_0, %c0_i32_1 : i32, i32, i32
  }
  func.func @transform_3(%arg0: i32) -> (i32, i32) {
    %c0_i32 = arith.constant 0 : i32
    %c0_i32_0 = arith.constant 0 : i32
    %c0_i32_1 = arith.constant 0 : i32
    return %c0_i32, %c0_i32_0 : i32, i32
  }
  func.func @transform_4(%arg0: i32) -> (i32, i32) {
    %c0_i32 = arith.constant 0 : i32
    %c0_i32_0 = arith.constant 0 : i32
    return %arg0, %c0_i32 : i32, i32
  }
}

</mosaic_0001>

<bundles_post_ra>
// kernel: _policy_means.1
= control target key start
LH: loop header
LB: loop body
LE: loop exit
PB: predicated region body
PF: predicated region fallthrough
CT: control target
= control target key end

     0   :  { %s1413_s15 = smov 0   ;;  %s1674_s0 = inlined_call_operand.vmem [shape: f32[256,2], index: 0, kind: input, shape index: {}]   ;;  %s1675_s1 = inlined_call_operand.vmem [shape: f32[2,128], index: 1, kind: input, shape index: {}]   ;;  %s1676_s2 = inlined_call_operand.vmem [shape: f32[2,128,128], index: 2, kind: input, shape index: {}]   ;;  %s1677_s3 = inlined_call_operand.vmem [shape: f32[3,128], index: 3, kind: input, shape index: {}]   ;;  %s1678_s4 = inlined_call_operand.vmem [shape: f32[256,128], index: 4, kind: output, shape index: {}]  }
   0x1 LB: > { %s1009_s16 = sadd.s32 4294967295, %s1383_s15   ;;  %p1013_p0 = scmp.ge.s32.totalorder %s1383_s15, 1  ;;  %s1383_s15 = sphi %s1413_s15, %s14_s15  }
   0x2   : > { %p163_p1 = scmp.lt.s32.totalorder %s1383_s15, 3 }
   0x4   : > { %p164_p2 = pnand %p1013_p0, %p163_p1 }
   0x5   : > { %s1014_s17 = sshll.u32 (!%p164_p2), %s1009_s16, 4  ;;  %v456_v0 = vld [vmem:[%s1676_s2] sm:$0xff] (!%p164_p2)  ;;  %v457_v1 = vld [vmem:[%s1676_s2 + $0x8] sm:$0xff] (!%p164_p2)  ;;  %v458_v2 = vld [vmem:[%s1676_s2 + $0x10] sm:$0xff] (!%p164_p2)  ;;  %v1385_v3 = vmov (!%p164_p2), 0   ;;  %v1386_v15 = vmov (!%p164_p2), 1  }
   0x6   : > { %167 = sbr.rel (%p164_p2) target bundleno = 679 (0x2a7), region = 36  ;;  %1310 = vset.pattern.permute.xlu1 (!%p164_p2), %v1385_v3  ;;  %1308 = vset.pattern.permute.xlu0 (!%p164_p2), %v1385_v3  ;;  %p190_p3 = scmp.lt.s32.totalorder (!%p164_p2), %s1014_s17, 31  ;;  %v1233_v4 = vpack.c.bf16 (!%p164_p2), %v457_v1, %v456_v0  ;;  %v459_v5 = vld [vmem:[%s1676_s2 + $0x18] sm:$0xff] (!%p164_p2)  ;;  %v460_v7 = vld [vmem:[%s1676_s2 + $0x20] sm:$0xff] (!%p164_p2)  ;;  %v461_v8 = vld [vmem:[%s1676_s2 + $0x28] sm:$0xff] (!%p164_p2) }
   0x7   : > { %v1237_v6 = vpack.c.bf16 (!%p164_p2), %v459_v5, %v458_v2  ;;  %v1241_v9 = vpack.c.bf16 (!%p164_p2), %v461_v8, %v460_v7  ;;  %v462_v12 = vld [vmem:[%s1676_s2 + $0x30] sm:$0xff] (!%p164_p2)  ;;  %v463_v13 = vld [vmem:[%s1676_s2 + $0x38] sm:$0xff] (!%p164_p2)  ;;  %v464_v16 = vld [vmem:[%s1676_s2 + $0x40] sm:$0xff] (!%p164_p2) }
   0x8   : > { %1234 = vmatprep.subr.bf16.mxu0 (!%p164_p2), %v1233_v4  ;;  %v1245_v14 = vpack.c.bf16 (!%p164_p2), %v463_v13, %v462_v12  ;;  %v465_v17 = vld [vmem:[%s1676_s2 + $0x48] sm:$0xff] (!%p164_p2)  ;;  %v466_v20 = vld [vmem:[%s1676_s2 + $0x50] sm:$0xff] (!%p164_p2)  ;;  %v467_v21 = vld [vmem:[%s1676_s2 + $0x58] sm:$0xff] (!%p164_p2) }
   0x9   : > { %1236 = vmatpush3.bf16.msra.mxu0 (!%p164_p2), %v1233_v4  ;;  %v1249_v19 = vpack.c.bf16 (!%p164_p2), %v465_v17, %v464_v16  ;;  %v1253_v23 = vpack.c.bf16 (!%p164_p2), %v467_v21, %v466_v20  ;;  %v468_v24 = vld [vmem:[%s1676_s2 + $0x60] sm:$0xff] (!%p164_p2)  ;;  %v469_v25 = vld [vmem:[%s1676_s2 + $0x68] sm:$0xff] (!%p164_p2)  ;;  %v470_v28 = vld [vmem:[%s1676_s2 + $0x70] sm:$0xff] (!%p164_p2) }
   0xa   : > { %1238 = vmatprep.subr.bf16.mxu0 (!%p164_p2), %v1237_v6  ;;  %v1257_v27 = vpack.c.bf16 (!%p164_p2), %v469_v25, %v468_v24  ;;  %v471_v29 = vld [vmem:[%s1676_s2 + $0x78] sm:$0xff] (!%p164_p2)  ;;  %v1022_v42 = vld [vmem:[%s1676_s2 + $0x80] sm:$0xff] (!%p164_p2)  ;;  %v1023_v43 = vld [vmem:[%s1676_s2 + $0x88] sm:$0xff] (!%p164_p2) }
   0xb   : > { %v1261_v31 = vpack.c.bf16 (!%p164_p2), %v471_v29, %v470_v28  ;;  %v1024_v44 = vld [vmem:[%s1676_s2 + $0x90] sm:$0xff] (!%p164_p2)  ;;  %v1265_v45 = vpack.c.bf16 (!%p164_p2), %v1023_v43, %v1022_v42  ;;  %v1025_v46 = vld [vmem:[%s1676_s2 + $0x98] sm:$0xff] (!%p164_p2)  ;;  %v1026_v48 = vld [vmem:[%s1676_s2 + $0xa0] sm:$0xff] (!%p164_p2) }
   0xc   : > { %v1269_v47 = vpack.c.bf16 (!%p164_p2), %v1025_v46, %v1024_v44  ;;  %v1027_v49 = vld [vmem:[%s1676_s2 + $0xa8] sm:$0xff] (!%p164_p2)  ;;  %v1028_v51 = vld [vmem:[%s1676_s2 + $0xb0] sm:$0xff] (!%p164_p2)  ;;  %v1029_v52 = vld [vmem:[%s1676_s2 + $0xb8] sm:$0xff] (!%p164_p2) }
   0xd   : > { %s1680_s17 = smov (!%p190_p3, %s1014_s17), 31  ;;  %1240 = vmatpush3.bf16.msra.mxu0 %v1237_v6  ;;  %1266 = vmatprep.subr.bf16.mxu1 %v1265_v45  ;;  %v1273_v50 = vpack.c.bf16 %v1027_v49, %v1026_v48  ;;  %v1277_v53 = vpack.c.bf16 %v1029_v52, %v1028_v51  ;;  %v1030_v54 = vld [vmem:[%s1676_s2 + $0xc0] sm:$0xff]  ;;  %v1031_v55 = vld [vmem:[%s1676_s2 + $0xc8] sm:$0xff]  ;;  %v1032_v57 = vld [vmem:[%s1676_s2 + $0xd0] sm:$0xff] }
   0xe   : > { %s1015_s30 = sshll.u32 %s1680_s17, 3  ;;  %1242 = vmatprep.subr.bf16.mxu0 %v1241_v9  ;;  %1268 = vmatpush3.bf16.msra.mxu1 %v1265_v45  ;;  %v1281_v56 = vpack.c.bf16 %v1031_v55, %v1030_v54  ;;  %v1033_v58 = vld [vmem:[%s1676_s2 + $0xd8] sm:$0xff]  ;;  %v1034_v60 = vld [vmem:[%s1676_s2 + $0xe0] sm:$0xff]  ;;  %v1035_v61 = vld [vmem:[%s1676_s2 + $0xe8] sm:$0xff] }
   0xf   : > { %s1447_s7 = scalar_lea.vmem %s1674_s0, %s1015_s30  ;;  %1270 = vmatprep.subr.bf16.mxu1 %v1269_v47  ;;  %v1285_v59 = vpack.c.bf16 %v1033_v58, %v1032_v57  ;;  %v1289_v62 = vpack.c.bf16 %v1035_v61, %v1034_v60  ;;  %v1540_v1 = vld [vmem:[%s1675_s1] ss:$0 sm:$0xff]  ;;  %v1545_v2 = vld [vmem:[%s1675_s1 + $0x1] ss:$0 sm:$0xff]  ;;  %s1630_s28 = scalar_lea.vmem %s1678_s4, %s1015_s30 }
  0x10   : > { %v202_v10 = vld [vmem:[%s1447_s7 + $0x8] sm:$0xff]  ;;  %v201_v11 = vld [vmem:[%s1447_s7] sm:$0xff]  ;;  %v203_v18 = vld [vmem:[%s1447_s7 + $0x10] sm:$0xff] }
  0x11   : > { %225 = vperm.xlu1 %1310, %v202_v10   ;;  %220 = vperm.xlu0 %1308, %v201_v11   ;;  %v204_v22 = vld [vmem:[%s1447_s7 + $0x18] sm:$0xff]  ;;  %v205_v26 = vld [vmem:[%s1447_s7 + $0x20] sm:$0xff]  ;;  %v206_v30 = vld [vmem:[%s1447_s7 + $0x28] sm:$0xff] }
  0x12   : > { %1244 = vmatpush3.bf16.msra.mxu0 %v1241_v9  ;;  %v207_v32 = vld [vmem:[%s1447_s7 + $0x30] sm:$0xff]  ;;  %v208_v33 = vld [vmem:[%s1447_s7 + $0x38] sm:$0xff]  ;;  %v209_v34 = vld [vmem:[%s1447_s7 + $0x40] sm:$0xff]  ;;  %1272 = vmatpush3.bf16.msra.mxu1 %v1269_v47 }
  0x13   : > { %1246 = vmatprep.subr.bf16.mxu0 %v1245_v14  ;;  %v210_v35 = vld [vmem:[%s1447_s7 + $0x48] sm:$0xff]  ;;  %v211_v36 = vld [vmem:[%s1447_s7 + $0x50] sm:$0xff]  ;;  %v212_v37 = vld [vmem:[%s1447_s7 + $0x58] sm:$0xff]  ;;  %1274 = vmatprep.subr.bf16.mxu1 %v1273_v50 }
  0x14   : > { %v213_v38 = vld [vmem:[%s1447_s7 + $0x60] sm:$0xff]  ;;  %v214_v39 = vld [vmem:[%s1447_s7 + $0x68] sm:$0xff]  ;;  %v215_v40 = vld [vmem:[%s1447_s7 + $0x70] sm:$0xff] }
  0x15   : > { %1311 = vset.pattern.permute.xlu1 %v1386_v15  ;;  %1309 = vset.pattern.permute.xlu0 %v1386_v15  ;;  %v216_v41 = vld [vmem:[%s1447_s7 + $0x78] sm:$0xff]  ;;  %v1554_v9 = vld [vmem:[%s1677_s3] ss:$0 sm:$0xff] }
  0x16   : > { %324 = vperm.xlu1 %1311, %v202_v10   ;;  %320 = vperm.xlu0 %1309, %v201_v11  }
  0x17   : > { %1248 = vmatpush3.bf16.msra.mxu0 %v1245_v14  ;;  %1276 = vmatpush3.bf16.msra.mxu1 %v1273_v50 }
  0x18   : > { %1250 = vmatprep.subr.bf16.mxu0 %v1249_v19  ;;  %1278 = vmatprep.subr.bf16.mxu1 %v1277_v53 }
  0x1a   : > { %1312 = vset.pattern.permute.xlu1 %v1385_v3  ;;  %328 = vperm.xlu0 %1309, %v203_v18  }
  0x1b   : > { %230 = vperm.xlu1 %1312, %v203_v18   ;;  %1252 = vmatpush3.bf16.msra.mxu0 %v1249_v19 }
  0x1c   : > { %1254 = vmatprep.subr.bf16.mxu0 %v1253_v23  ;;  %1280 = vmatpush3.bf16.msra.mxu1 %v1277_v53 }
  0x1d   : > { %1282 = vmatprep.subr.bf16.mxu1 %v1281_v56 }
  0x1e   : > { %332 = vperm.xlu0 %1309, %v204_v22  }
  0x1f   : > { %235 = vperm.xlu1 %1312, %v204_v22   ;;  %1256 = vmatpush3.bf16.msra.mxu0 %v1253_v23 }
  0x20   : > { %1258 = vmatprep.subr.bf16.mxu0 %v1257_v27  ;;  %1284 = vmatpush3.bf16.msra.mxu1 %v1281_v56 }
  0x21   : > { %1286 = vmatprep.subr.bf16.mxu1 %v1285_v59 }
  0x22   : > { %336 = vperm.xlu0 %1309, %v205_v26  }
  0x23   : > { %240 = vperm.xlu1 %1312, %v205_v26   ;;  %1260 = vmatpush3.bf16.msra.mxu0 %v1257_v27 }
  0x24   : > { %1262 = vmatprep.subr.bf16.mxu0 %v1261_v31  ;;  %1288 = vmatpush3.bf16.msra.mxu1 %v1285_v59 }
  0x25   : > { %1290 = vmatprep.subr.bf16.mxu1 %v1289_v62 }
  0x26   : > { %340 = vperm.xlu0 %1309, %v206_v30  }
  0x27   : > { %245 = vperm.xlu1 %1312, %v206_v30   ;;  %1264 = vmatpush3.bf16.msra.mxu0 %v1261_v31 }
  0x28   : > { %1292 = vmatpush3.bf16.msra.mxu1 %v1289_v62 }
  0x2a   : > { %344 = vperm.xlu0 %1309, %v207_v32  }
  0x2b   : > { %250 = vperm.xlu1 %1312, %v207_v32  }
  0x2e   : > { %348 = vperm.xlu0 %1309, %v208_v33  }
  0x2f   : > { %255 = vperm.xlu1 %1312, %v208_v33  }
  0x32   : > { %352 = vperm.xlu0 %1309, %v209_v34  }
  0x33   : > { %260 = vperm.xlu1 %1312, %v209_v34  }
  0x36   : > { %356 = vperm.xlu0 %1309, %v210_v35  }
  0x37   : > { %265 = vperm.xlu1 %1312, %v210_v35  }
  0x3a   : > { %360 = vperm.xlu0 %1309, %v211_v36  }
  0x3b   : > { %270 = vperm.xlu1 %1312, %v211_v36  }
  0x3e   : > { %364 = vperm.xlu0 %1309, %v212_v37  }
  0x3f   : > { %275 = vperm.xlu1 %1312, %v212_v37  }
  0x42   : > { %368 = vperm.xlu0 %1309, %v213_v38  }
  0x43   : > { %280 = vperm.xlu1 %1312, %v213_v38  }
  0x46   : > { %372 = vperm.xlu0 %1309, %v214_v39  }
  0x47   : > { %285 = vperm.xlu1 %1312, %v214_v39  }
  0x4a   : > { %376 = vperm.xlu0 %1309, %v215_v40  }
  0x4b   : > { %290 = vperm.xlu1 %1312, %v215_v40  }
  0x4e   : > { %380 = vperm.xlu0 %1309, %v216_v41  }
  0x4f   : > { %295 = vperm.xlu1 %1312, %v216_v41  }
  0x90   : > { %v226_v63 = vpop.permute.xlu1 %225  ;;  %v221_v0 = vpop.permute.xlu0 %220 }
  0x91   : > { %v303_v5 = vmul.f32 %v1540_v1, %v226_v63  ;;  %v302_v6 = vmul.f32 %v1540_v1, %v221_v0 }
  0x95   : > { %v325_v3 = vpop.permute.xlu1 %324  ;;  %v321_v4 = vpop.permute.xlu0 %320 }
  0x96   : > { %v388_v7 = vmul.f32 %v1545_v2, %v325_v3  ;;  %v387_v8 = vmul.f32 %v1545_v2, %v321_v4 }
  0x98   : > { %v404_v10 = vadd.f32 %v388_v7, %v303_v5  ;;  %v403_v11 = vadd.f32 %v387_v8, %v302_v6 }
  0x99   : > { %v329_v12 = vpop.permute.xlu0 %328 }
  0x9a   : > { %v389_v13 = vmul.f32 %v1545_v2, %v329_v12  ;;  %v231_v14 = vpop.permute.xlu1 %230  ;;  %v424_v15 = vadd.f32 %v1554_v9, %v403_v11  ;;  %v425_v16 = vadd.f32 %v1554_v9, %v404_v10 }
  0x9b   : > { %v304_v17 = vmul.f32 %v1540_v1, %v231_v14 }
  0x9c   : > { %v440_v18 = vmax.f32 %v424_v15, 0.0  ;;  %v441_v19 = vmax.f32 %v425_v16, 0.0 }
  0x9d   : > { %v405_v20 = vadd.f32 %v389_v13, %v304_v17  ;;  %v333_v21 = vpop.permute.xlu0 %332 }
  0x9e   : > { %v390_v22 = vmul.f32 %v1545_v2, %v333_v21  ;;  %v236_v23 = vpop.permute.xlu1 %235  ;;  %1153 = vmatprep.mubr.f32.mxu0 %v440_v18 }
  0x9f   : > { %v305_v24 = vmul.f32 %v1540_v1, %v236_v23  ;;  %1154 = vmatmul.mubr.f32.vlgmr.msra.gmra.mrb[0].mxu0 %v441_v19  ;;  %v426_v25 = vadd.f32 %v1554_v9, %v405_v20 }
  0xa1   : > { %v406_v26 = vadd.f32 %v390_v22, %v305_v24  ;;  %v337_v27 = vpop.permute.xlu0 %336  ;;  %v442_v28 = vmax.f32 %v426_v25, 0.0 }
  0xa2   : > { %v391_v29 = vmul.f32 %v1545_v2, %v337_v27  ;;  %v241_v30 = vpop.permute.xlu1 %240 }
  0xa3   : > { %v306_v31 = vmul.f32 %v1540_v1, %v241_v30  ;;  %1156 = vmatprep.mubr.f32.mxu0 %v442_v28  ;;  %v427_v32 = vadd.f32 %v1554_v9, %v406_v26 }
  0xa5   : > { %v407_v33 = vadd.f32 %v391_v29, %v306_v31  ;;  %v341_v34 = vpop.permute.xlu0 %340  ;;  %v443_v35 = vmax.f32 %v427_v32, 0.0 }
  0xa6   : > { %v392_v36 = vmul.f32 %v1545_v2, %v341_v34  ;;  %v246_v37 = vpop.permute.xlu1 %245 }
  0xa7   : > { %v307_v38 = vmul.f32 %v1540_v1, %v246_v37  ;;  %1157 = vmatmul.mubr.f32.gmra.mrb[2].mxu0 %v443_v35  ;;  %v428_v39 = vadd.f32 %v1554_v9, %v407_v33 }
  0xa9   : > { %v408_v40 = vadd.f32 %v392_v36, %v307_v38  ;;  %v345_v41 = vpop.permute.xlu0 %344  ;;  %v444_v42 = vmax.f32 %v428_v39, 0.0 }
  0xaa   : > { %v393_v43 = vmul.f32 %v1545_v2, %v345_v41  ;;  %v251_v44 = vpop.permute.xlu1 %250 }
  0xab   : > { %v308_v45 = vmul.f32 %v1540_v1, %v251_v44  ;;  %1159 = vmatprep.mubr.f32.mxu0 %v444_v42  ;;  %v429_v46 = vadd.f32 %v1554_v9, %v408_v40 }
  0xad   : > { %v409_v47 = vadd.f32 %v393_v43, %v308_v45  ;;  %v349_v48 = vpop.permute.xlu0 %348  ;;  %v445_v49 = vmax.f32 %v429_v46, 0.0 }
  0xae   : > { %v394_v50 = vmul.f32 %v1545_v2, %v349_v48  ;;  %v256_v51 = vpop.permute.xlu1 %255 }
  0xaf   : > { %v309_v52 = vmul.f32 %v1540_v1, %v256_v51  ;;  %1160 = vmatmul.mubr.f32.gmra.mrb[4].mxu0 %v445_v49  ;;  %v430_v53 = vadd.f32 %v1554_v9, %v409_v47 }
  0xb1   : > { %v410_v54 = vadd.f32 %v394_v50, %v309_v52  ;;  %v353_v55 = vpop.permute.xlu0 %352  ;;  %v446_v56 = vmax.f32 %v430_v53, 0.0  ;;  %v1036_v53 = vld [vmem:[%s1676_s2 + $0xf0] sm:$0xff] }
  0xb2   : > { %v395_v57 = vmul.f32 %v1545_v2, %v353_v55  ;;  %v261_v58 = vpop.permute.xlu1 %260 }
  0xb3   : > { %v310_v59 = vmul.f32 %v1540_v1, %v261_v58  ;;  %1162 = vmatprep.mubr.f32.mxu0 %v446_v56  ;;  %v431_v60 = vadd.f32 %v1554_v9, %v410_v54 }
  0xb5   : > { %v411_v61 = vadd.f32 %v395_v57, %v310_v59  ;;  %v357_v62 = vpop.permute.xlu0 %356  ;;  %v447_v63 = vmax.f32 %v431_v60, 0.0 }
  0xb6   : > { %v396_v0 = vmul.f32 %v1545_v2, %v357_v62  ;;  %v266_v3 = vpop.permute.xlu1 %265 }
  0xb7   : > { %v311_v4 = vmul.f32 %v1540_v1, %v266_v3  ;;  %1163 = vmatmul.mubr.f32.gmra.mrb[6].mxu0 %v447_v63  ;;  %v432_v5 = vadd.f32 %v1554_v9, %v411_v61 }
  0xb9   : > { %v412_v6 = vadd.f32 %v396_v0, %v311_v4  ;;  %v361_v7 = vpop.permute.xlu0 %360  ;;  %v448_v8 = vmax.f32 %v432_v5, 0.0 }
  0xba   : > { %v397_v10 = vmul.f32 %v1545_v2, %v361_v7  ;;  %v271_v11 = vpop.permute.xlu1 %270 }
  0xbb   : > { %v312_v12 = vmul.f32 %v1540_v1, %v271_v11  ;;  %1165 = vmatprep.mubr.f32.mxu0 %v448_v8  ;;  %v433_v13 = vadd.f32 %v1554_v9, %v412_v6 }
  0xbd   : > { %v413_v14 = vadd.f32 %v397_v10, %v312_v12  ;;  %v365_v15 = vpop.permute.xlu0 %364  ;;  %v449_v16 = vmax.f32 %v433_v13, 0.0 }
  0xbe   : > { %v398_v17 = vmul.f32 %v1545_v2, %v365_v15  ;;  %v276_v18 = vpop.permute.xlu1 %275 }
  0xbf   : > { %v313_v19 = vmul.f32 %v1540_v1, %v276_v18  ;;  %1166 = vmatmul.mubr.f32.gmra.mrb[8].mxu0 %v449_v16  ;;  %v434_v20 = vadd.f32 %v1554_v9, %v413_v14 }
  0xc1   : > { %v414_v21 = vadd.f32 %v398_v17, %v313_v19  ;;  %v369_v22 = vpop.permute.xlu0 %368  ;;  %v450_v23 = vmax.f32 %v434_v20, 0.0 }
  0xc2   : > { %v399_v24 = vmul.f32 %v1545_v2, %v369_v22  ;;  %v281_v25 = vpop.permute.xlu1 %280 }
  0xc3   : > { %v314_v26 = vmul.f32 %v1540_v1, %v281_v25  ;;  %1168 = vmatprep.mubr.f32.mxu0 %v450_v23  ;;  %v435_v27 = vadd.f32 %v1554_v9, %v414_v21 }
  0xc5   : > { %v415_v28 = vadd.f32 %v399_v24, %v314_v26  ;;  %v373_v29 = vpop.permute.xlu0 %372  ;;  %v451_v30 = vmax.f32 %v435_v27, 0.0 }
  0xc6   : > { %v400_v31 = vmul.f32 %v1545_v2, %v373_v29  ;;  %v286_v32 = vpop.permute.xlu1 %285 }
  0xc7   : > { %v315_v33 = vmul.f32 %v1540_v1, %v286_v32  ;;  %1169 = vmatmul.mubr.f32.gmra.mrb[10].mxu0 %v451_v30  ;;  %v436_v34 = vadd.f32 %v1554_v9, %v415_v28 }
  0xc9   : > { %v416_v35 = vadd.f32 %v400_v31, %v315_v33  ;;  %v377_v36 = vpop.permute.xlu0 %376  ;;  %v452_v37 = vmax.f32 %v436_v34, 0.0 }
  0xca   : > { %v401_v38 = vmul.f32 %v1545_v2, %v377_v36  ;;  %v291_v39 = vpop.permute.xlu1 %290 }
  0xcb   : > { %v316_v40 = vmul.f32 %v1540_v1, %v291_v39  ;;  %1171 = vmatprep.mubr.f32.mxu0 %v452_v37  ;;  %v437_v41 = vadd.f32 %v1554_v9, %v416_v35 }
  0xcd   : > { %v417_v42 = vadd.f32 %v401_v38, %v316_v40  ;;  %v381_v43 = vpop.permute.xlu0 %380  ;;  %v453_v44 = vmax.f32 %v437_v41, 0.0  ;;  %v1612_v41 = vld [vmem:[%s1677_s3 + $0x2] ss:$0 sm:$0xff] }
  0xce   : > { %v402_v45 = vmul.f32 %v1545_v2, %v381_v43  ;;  %v296_v46 = vpop.permute.xlu1 %295  ;;  %v1037_v2 = vld [vmem:[%s1676_s2 + $0xf8] sm:$0xff] }
  0xcf   : > { %v317_v47 = vmul.f32 %v1540_v1, %v296_v46  ;;  %1172 = vmatmul.mubr.f32.gmra.mrb[12].mxu0 %v453_v44  ;;  %v438_v48 = vadd.f32 %v1554_v9, %v417_v42  ;;  %v1293_v54 = vpack.c.bf16 %v1037_v2, %v1036_v53  ;;  %v1021_v1 = vld [vmem:[%s1677_s3 + $0x1] ss:$0 sm:$0xff] }
  0xd1   : > { %v418_v49 = vadd.f32 %v402_v45, %v317_v47  ;;  %v454_v50 = vmax.f32 %v438_v48, 0.0  ;;  %1294 = vmatprep.subr.bf16.mxu1 %v1293_v54 }
  0xd2   : > { %1296 = vmatpush3.bf16.msra.mxu1 %v1293_v54  ;;  %v805_v54 = vlaneseq }
  0xd3   : > { %1174 = vmatprep.mubr.f32.mxu0 %v454_v50  ;;  %v439_v51 = vadd.f32 %v1554_v9, %v418_v49 }
  0xd5   : > { %v455_v52 = vmax.f32 %v439_v51, 0.0 }
  0xd7   : > { %1175 = vmatmul.mubr.f32.gmra.mrb[14].mxu0 %v455_v52 }
 0x172   : > { %v1155_v55 = vpop.f32.mrb[0].mxu0 }
 0x173   : > { %v549_v56 = vadd.f32 %v1155_v55, %v1021_v1  ;;  %v543_v9 = vpop.f32.mrb[1].mxu0 }
 0x174   : > { %v544_v57 = vadd.f32 %v1021_v1, %v543_v9 }
 0x175   : > { %v623_v59 = vmax.f32 %v549_v56, 0.0 }
 0x176   : > { %v622_v58 = vmax.f32 %v544_v57, 0.0 }
 0x178   : > { %1209 = vmatprep.mubr.f32.mxu1 %v622_v58 }
 0x179   : > { %1210 = vmatmul.mubr.f32.vlgmr.msra.gmra.mrb[0].mxu1 %v623_v59 }
 0x17a   : > { %v1158_v60 = vpop.f32.mrb[2].mxu0 }
 0x17b   : > { %v559_v61 = vadd.f32 %v1158_v60, %v1021_v1  ;;  %v553_v62 = vpop.f32.mrb[3].mxu0  ;;  %v806_v60 = vand.u32 127, %v805_v54 }
 0x17c   : > { %v554_v63 = vadd.f32 %v1021_v1, %v553_v62 }
 0x17d   : > { %v625_v3 = vmax.f32 %v559_v61, 0.0  ;;  %vm807_vm0 = vcmp.eq.s32.totalorder %v806_v60, 0 }
 0x17e   : > { %v624_v0 = vmax.f32 %v554_v63, 0.0 }
 0x180   : > { %1212 = vmatprep.mubr.f32.mxu1 %v624_v0 }
 0x181   : > { %1213 = vmatmul.mubr.f32.gmra.mrb[2].mxu1 %v625_v3 }
 0x182   : > { %v1161_v4 = vpop.f32.mrb[4].mxu0 }
 0x183   : > { %v569_v5 = vadd.f32 %v1161_v4, %v1021_v1  ;;  %v563_v6 = vpop.f32.mrb[5].mxu0 }
 0x184   : > { %v564_v7 = vadd.f32 %v1021_v1, %v563_v6 }
 0x185   : > { %v627_v10 = vmax.f32 %v569_v5, 0.0 }
 0x186   : > { %v626_v8 = vmax.f32 %v564_v7, 0.0 }
 0x188   : > { %1215 = vmatprep.mubr.f32.mxu1 %v626_v8  ;;  %v1387_v8 = vmov 6.2831855  }
 0x189   : > { %1216 = vmatmul.mubr.f32.gmra.mrb[4].mxu1 %v627_v10  ;;  %v1621_v10 = vsel %vm807_vm0, 5.0, %v1387_v8 }
 0x18a   : > { %v1164_v11 = vpop.f32.mrb[6].mxu0 }
 0x18b   : > { %v579_v12 = vadd.f32 %v1164_v11, %v1021_v1  ;;  %v573_v13 = vpop.f32.mrb[7].mxu0 }
 0x18c   : > { %v574_v14 = vadd.f32 %v1021_v1, %v573_v13 }
 0x18d   : > { %v629_v16 = vmax.f32 %v579_v12, 0.0 }
 0x18e   : > { %v628_v15 = vmax.f32 %v574_v14, 0.0 }
 0x190   : > { %1218 = vmatprep.mubr.f32.mxu1 %v628_v15 }
 0x191   : > { %1219 = vmatmul.mubr.f32.gmra.mrb[6].mxu1 %v629_v16 }
 0x192   : > { %v1167_v17 = vpop.f32.mrb[8].mxu0 }
 0x193   : > { %v589_v18 = vadd.f32 %v1167_v17, %v1021_v1  ;;  %v583_v19 = vpop.f32.mrb[9].mxu0 }
 0x194   : > { %v584_v20 = vadd.f32 %v1021_v1, %v583_v19 }
 0x195   : > { %v631_v22 = vmax.f32 %v589_v18, 0.0 }
 0x196   : > { %v630_v21 = vmax.f32 %v584_v20, 0.0 }
 0x198   : > { %1221 = vmatprep.mubr.f32.mxu1 %v630_v21 }
 0x199   : > { %1222 = vmatmul.mubr.f32.gmra.mrb[8].mxu1 %v631_v22 }
 0x19a   : > { %v1170_v23 = vpop.f32.mrb[10].mxu0 }
 0x19b   : > { %v599_v24 = vadd.f32 %v1170_v23, %v1021_v1  ;;  %v593_v25 = vpop.f32.mrb[11].mxu0 }
 0x19c   : > { %v594_v26 = vadd.f32 %v1021_v1, %v593_v25 }
 0x19d   : > { %v633_v28 = vmax.f32 %v599_v24, 0.0 }
 0x19e   : > { %v632_v27 = vmax.f32 %v594_v26, 0.0 }
 0x1a0   : > { %1224 = vmatprep.mubr.f32.mxu1 %v632_v27 }
 0x1a1   : > { %1225 = vmatmul.mubr.f32.gmra.mrb[10].mxu1 %v633_v28 }
 0x1a2   : > { %v1173_v29 = vpop.f32.mrb[12].mxu0 }
 0x1a3   : > { %v609_v30 = vadd.f32 %v1173_v29, %v1021_v1  ;;  %v603_v31 = vpop.f32.mrb[13].mxu0 }
 0x1a4   : > { %v604_v32 = vadd.f32 %v1021_v1, %v603_v31 }
 0x1a5   : > { %v635_v34 = vmax.f32 %v609_v30, 0.0 }
 0x1a6   : > { %v634_v33 = vmax.f32 %v604_v32, 0.0 }
 0x1a8   : > { %1227 = vmatprep.mubr.f32.mxu1 %v634_v33 }
 0x1a9   : > { %1228 = vmatmul.mubr.f32.gmra.mrb[12].mxu1 %v635_v34 }
 0x1aa   : > { %v1176_v35 = vpop.f32.mrb[14].mxu0 }
 0x1ab   : > { %v619_v36 = vadd.f32 %v1176_v35, %v1021_v1  ;;  %v613_v37 = vpop.f32.mrb[15].mxu0 }
 0x1ac   : > { %v614_v38 = vadd.f32 %v1021_v1, %v613_v37 }
 0x1ad   : > { %v637_v40 = vmax.f32 %v619_v36, 0.0 }
 0x1ae   : > { %v636_v39 = vmax.f32 %v614_v38, 0.0 }
 0x1b0   : > { %1230 = vmatprep.mubr.f32.mxu1 %v636_v39 }
 0x1b1   : > { %1231 = vmatmul.mubr.f32.gmra.mrb[14].mxu1 %v637_v40 }
 0x24c   : > { %v1211_v42 = vpop.f32.mrb[0].mxu1 }
 0x24d   : > { %v732_v43 = vadd.f32 %v1211_v42, %v1612_v41  ;;  %v726_v44 = vpop.f32.mrb[1].mxu1 }
 0x24e   : > { %v727_v45 = vadd.f32 %v1612_v41, %v726_v44 }
 0x24f   : > { %v1040_v46 = vmul.f32 -1.442695, %v732_v43 }
 0x250   : > { %v1039_v47 = vmul.f32 -1.442695, %v727_v45 }
 0x251   : > { %1313 = vpow2.f32 %v1040_v46 }
 0x252   : > { %1315 = vpow2.f32 %v1039_v47 }
 0x254   : > { %v1214_v48 = vpop.f32.mrb[2].mxu1 }
 0x255   : > { %v742_v49 = vadd.f32 %v1214_v48, %v1612_v41  ;;  %v736_v50 = vpop.f32.mrb[3].mxu1 }
 0x256   : > { %v737_v51 = vadd.f32 %v1612_v41, %v736_v50 }
 0x257   : > { %v1042_v52 = vmul.f32 -1.442695, %v742_v49 }
 0x258   : > { %v1041_v53 = vmul.f32 -1.442695, %v737_v51 }
 0x259   : > { %1317 = vpow2.f32 %v1042_v52 }
 0x25a   : > { %1319 = vpow2.f32 %v1041_v53 }
 0x25b   : > { %v1314_v2 = vpop.eup %1313 }
 0x25c   : > { %v1316_v1 = vpop.eup %1315  ;;  %v858_v55 = vadd.f32 1.0, %v1314_v2  ;;  %v1217_v56 = vpop.f32.mrb[4].mxu1 }
 0x25d   : > { %v857_v9 = vadd.f32 1.0, %v1316_v1  ;;  %v752_v57 = vadd.f32 %v1217_v56, %v1612_v41  ;;  %v746_v58 = vpop.f32.mrb[5].mxu1 }
 0x25e   : > { %1321 = vrcp.f32 %v858_v55  ;;  %v747_v59 = vadd.f32 %v1612_v41, %v746_v58 }
 0x25f   : > { %1323 = vrcp.f32 %v857_v9  ;;  %v1044_v61 = vmul.f32 -1.442695, %v752_v57 }
 0x260   : > { %v1043_v62 = vmul.f32 -1.442695, %v747_v59 }
 0x261   : > { %1325 = vpow2.f32 %v1044_v61 }
 0x262   : > { %1327 = vpow2.f32 %v1043_v62 }
 0x263   : > { %v1318_v63 = vpop.eup %1317 }
 0x264   : > { %v1320_v0 = vpop.eup %1319  ;;  %v860_v3 = vadd.f32 1.0, %v1318_v63  ;;  %v1220_v4 = vpop.f32.mrb[6].mxu1 }
 0x265   : > { %v859_v5 = vadd.f32 1.0, %v1320_v0  ;;  %v762_v6 = vadd.f32 %v1220_v4, %v1612_v41  ;;  %v756_v7 = vpop.f32.mrb[7].mxu1 }
 0x266   : > { %1329 = vrcp.f32 %v860_v3  ;;  %v757_v11 = vadd.f32 %v1612_v41, %v756_v7 }
 0x267   : > { %1331 = vrcp.f32 %v859_v5  ;;  %v1046_v12 = vmul.f32 -1.442695, %v762_v6 }
 0x268   : > { %v1322_v13 = vpop.eup %1321  ;;  %v1045_v14 = vmul.f32 -1.442695, %v757_v11 }
 0x269   : > { %v1324_v15 = vpop.eup %1323  ;;  %v906_v16 = vmul.f32 %v1322_v13, %v1621_v10  ;;  %1333 = vpow2.f32 %v1046_v12 }
 0x26a   : > { %v905_v17 = vmul.f32 %v1324_v15, %v1621_v10  ;;  %1335 = vpow2.f32 %v1045_v14 }
 0x26b   : > { %v1326_v18 = vpop.eup %1325  ;;  %v922_v19 = vadd.f32 1e-06, %v906_v16 }
 0x26c   : > { %v1328_v20 = vpop.eup %1327  ;;  %v921_v21 = vadd.f32 1e-06, %v905_v17  ;;  %v862_v22 = vadd.f32 1.0, %v1326_v18  ;;  %v1223_v23 = vpop.f32.mrb[8].mxu1 }
 0x26d   : > { %938 = vst [vmem:[%s1630_s28 + $0x8] sm:$0xff] %v922_v19  ;;  %v861_v24 = vadd.f32 1.0, %v1328_v20  ;;  %v772_v25 = vadd.f32 %v1223_v23, %v1612_v41  ;;  %v766_v26 = vpop.f32.mrb[9].mxu1 }
 0x26e   : > { %937 = vst [vmem:[%s1630_s28] sm:$0xff] %v921_v21  ;;  %1337 = vrcp.f32 %v862_v22  ;;  %v767_v27 = vadd.f32 %v1612_v41, %v766_v26 }
 0x26f   : > { %1339 = vrcp.f32 %v861_v24  ;;  %v1048_v28 = vmul.f32 -1.442695, %v772_v25 }
 0x270   : > { %v1330_v29 = vpop.eup %1329  ;;  %v1047_v30 = vmul.f32 -1.442695, %v767_v27 }
 0x271   : > { %v1332_v31 = vpop.eup %1331  ;;  %v908_v32 = vmul.f32 %v1330_v29, %v1621_v10  ;;  %1341 = vpow2.f32 %v1048_v28 }
 0x272   : > { %v907_v33 = vmul.f32 %v1332_v31, %v1621_v10  ;;  %1343 = vpow2.f32 %v1047_v30 }
 0x273   : > { %v1334_v34 = vpop.eup %1333  ;;  %v924_v35 = vadd.f32 1e-06, %v908_v32 }
 0x274   : > { %v1336_v36 = vpop.eup %1335  ;;  %v923_v37 = vadd.f32 1e-06, %v907_v33  ;;  %v864_v38 = vadd.f32 1.0, %v1334_v34  ;;  %v1226_v39 = vpop.f32.mrb[10].mxu1 }
 0x275   : > { %940 = vst [vmem:[%s1630_s28 + $0x18] sm:$0xff] %v924_v35  ;;  %v863_v40 = vadd.f32 1.0, %v1336_v36  ;;  %v782_v42 = vadd.f32 %v1226_v39, %v1612_v41  ;;  %v776_v43 = vpop.f32.mrb[11].mxu1 }
 0x276   : > { %939 = vst [vmem:[%s1630_s28 + $0x10] sm:$0xff] %v923_v37  ;;  %1345 = vrcp.f32 %v864_v38  ;;  %v777_v44 = vadd.f32 %v1612_v41, %v776_v43 }
 0x277   : > { %1347 = vrcp.f32 %v863_v40  ;;  %v1050_v45 = vmul.f32 -1.442695, %v782_v42 }
 0x278   : > { %v1338_v46 = vpop.eup %1337  ;;  %v1049_v47 = vmul.f32 -1.442695, %v777_v44 }
 0x279   : > { %v1340_v48 = vpop.eup %1339  ;;  %v910_v49 = vmul.f32 %v1338_v46, %v1621_v10  ;;  %1349 = vpow2.f32 %v1050_v45 }
 0x27a   : > { %v909_v50 = vmul.f32 %v1340_v48, %v1621_v10  ;;  %1351 = vpow2.f32 %v1049_v47 }
 0x27b   : > { %v1342_v51 = vpop.eup %1341  ;;  %v926_v52 = vadd.f32 1e-06, %v910_v49 }
 0x27c   : > { %v1344_v53 = vpop.eup %1343  ;;  %v925_v2 = vadd.f32 1e-06, %v909_v50  ;;  %v866_v54 = vadd.f32 1.0, %v1342_v51  ;;  %v1229_v1 = vpop.f32.mrb[12].mxu1 }
 0x27d   : > { %942 = vst [vmem:[%s1630_s28 + $0x28] sm:$0xff] %v926_v52  ;;  %v865_v55 = vadd.f32 1.0, %v1344_v53  ;;  %v792_v56 = vadd.f32 %v1229_v1, %v1612_v41  ;;  %v786_v9 = vpop.f32.mrb[13].mxu1 }
 0x27e   : > { %941 = vst [vmem:[%s1630_s28 + $0x20] sm:$0xff] %v925_v2  ;;  %1353 = vrcp.f32 %v866_v54  ;;  %v787_v57 = vadd.f32 %v1612_v41, %v786_v9 }
 0x27f   : > { %1355 = vrcp.f32 %v865_v55  ;;  %v1052_v58 = vmul.f32 -1.442695, %v792_v56 }
 0x280   : > { %v1346_v59 = vpop.eup %1345  ;;  %v1051_v60 = vmul.f32 -1.442695, %v787_v57 }
 0x281   : > { %v1348_v61 = vpop.eup %1347  ;;  %v912_v62 = vmul.f32 %v1346_v59, %v1621_v10  ;;  %1357 = vpow2.f32 %v1052_v58 }
 0x282   : > { %v911_v63 = vmul.f32 %v1348_v61, %v1621_v10  ;;  %1359 = vpow2.f32 %v1051_v60 }
 0x283   : > { %v1350_v0 = vpop.eup %1349  ;;  %v928_v3 = vadd.f32 1e-06, %v912_v62 }
 0x284   : > { %v1352_v4 = vpop.eup %1351  ;;  %v927_v5 = vadd.f32 1e-06, %v911_v63  ;;  %v868_v6 = vadd.f32 1.0, %v1350_v0  ;;  %v1232_v7 = vpop.f32.mrb[14].mxu1 }
 0x285   : > { %944 = vst [vmem:[%s1630_s28 + $0x38] sm:$0xff] %v928_v3  ;;  %v867_v8 = vadd.f32 1.0, %v1352_v4  ;;  %v802_v11 = vadd.f32 %v1232_v7, %v1612_v41  ;;  %v796_v12 = vpop.f32.mrb[15].mxu1 }
 0x286   : > { %943 = vst [vmem:[%s1630_s28 + $0x30] sm:$0xff] %v927_v5  ;;  %1361 = vrcp.f32 %v868_v6  ;;  %v797_v13 = vadd.f32 %v1612_v41, %v796_v12 }
 0x287   : > { %1363 = vrcp.f32 %v867_v8  ;;  %v1054_v14 = vmul.f32 -1.442695, %v802_v11 }
 0x288   : > { %v1354_v15 = vpop.eup %1353  ;;  %v1053_v16 = vmul.f32 -1.442695, %v797_v13 }
 0x289   : > { %v1356_v17 = vpop.eup %1355  ;;  %v914_v18 = vmul.f32 %v1354_v15, %v1621_v10  ;;  %1365 = vpow2.f32 %v1054_v14 }
 0x28a   : > { %v913_v19 = vmul.f32 %v1356_v17, %v1621_v10  ;;  %1367 = vpow2.f32 %v1053_v16 }
 0x28b   : > { %v1358_v20 = vpop.eup %1357  ;;  %v930_v21 = vadd.f32 1e-06, %v914_v18 }
 0x28c   : > { %v1360_v22 = vpop.eup %1359  ;;  %v929_v23 = vadd.f32 1e-06, %v913_v19  ;;  %v870_v24 = vadd.f32 1.0, %v1358_v20 }
 0x28d   : > { %946 = vst [vmem:[%s1630_s28 + $0x48] sm:$0xff] %v930_v21  ;;  %v869_v41 = vadd.f32 1.0, %v1360_v22 }
 0x28e   : > { %945 = vst [vmem:[%s1630_s28 + $0x40] sm:$0xff] %v929_v23  ;;  %1369 = vrcp.f32 %v870_v24 }
 0x28f   : > { %1371 = vrcp.f32 %v869_v41 }
 0x290   : > { %v1362_v25 = vpop.eup %1361 }
 0x291   : > { %v1364_v26 = vpop.eup %1363  ;;  %v916_v27 = vmul.f32 %v1362_v25, %v1621_v10 }
 0x292   : > { %v915_v28 = vmul.f32 %v1364_v26, %v1621_v10 }
 0x293   : > { %v1366_v29 = vpop.eup %1365  ;;  %v932_v30 = vadd.f32 1e-06, %v916_v27 }
 0x294   : > { %v1368_v31 = vpop.eup %1367  ;;  %v931_v32 = vadd.f32 1e-06, %v915_v28  ;;  %v872_v33 = vadd.f32 1.0, %v1366_v29 }
 0x295   : > { %948 = vst [vmem:[%s1630_s28 + $0x58] sm:$0xff] %v932_v30  ;;  %v871_v34 = vadd.f32 1.0, %v1368_v31 }
 0x296   : > { %947 = vst [vmem:[%s1630_s28 + $0x50] sm:$0xff] %v931_v32  ;;  %1373 = vrcp.f32 %v872_v33 }
 0x297   : > { %1375 = vrcp.f32 %v871_v34 }
 0x298   : > { %v1370_v35 = vpop.eup %1369 }
 0x299   : > { %v1372_v36 = vpop.eup %1371  ;;  %v918_v37 = vmul.f32 %v1370_v35, %v1621_v10 }
 0x29a   : > { %v917_v38 = vmul.f32 %v1372_v36, %v1621_v10 }
 0x29b   : > { %v934_v39 = vadd.f32 1e-06, %v918_v37 }
 0x29c   : > { %v933_v40 = vadd.f32 1e-06, %v917_v38 }
 0x29d   : > { %950 = vst [vmem:[%s1630_s28 + $0x68] sm:$0xff] %v934_v39 }
 0x29e   : > { %949 = vst [vmem:[%s1630_s28 + $0x60] sm:$0xff] %v933_v40 }
 0x2a0   : > { %v1374_v42 = vpop.eup %1373 }
 0x2a1   : > { %v1376_v43 = vpop.eup %1375  ;;  %v920_v44 = vmul.f32 %v1374_v42, %v1621_v10 }
 0x2a2   : > { %v919_v45 = vmul.f32 %v1376_v43, %v1621_v10 }
 0x2a3   : > { %v936_v46 = vadd.f32 1e-06, %v920_v44 }
 0x2a4   : > { %v935_v47 = vadd.f32 1e-06, %v919_v45 }
 0x2a5   : > { %952 = vst [vmem:[%s1630_s28 + $0x78] sm:$0xff] %v936_v46 }
 0x2a6   : > { %951 = vst [vmem:[%s1630_s28 + $0x70] sm:$0xff] %v935_v47 }
 0x2a7 PF: > { %s14_s15 = sadd.s32 1, %s1383_s15  }
 0x2a8   : > { %p11_p4 = scmp.ge.s32.totalorder %s14_s15, 4  }
 0x2aa   :  { %13 = sbr.rel (!%p11_p4) target bundleno = 1 (0x1), region = 67 }

</bundles_post_ra>
